<compile_context>
chip_gen: v7x
topology: tpu7x:2x2x1
jax: 0.10.0
libtpu: 0.0.40
codegen_flags: <defaults>
</compile_context>

<pallas_src>
import functools

import jax
import jax.numpy as jnp
from jax.experimental import pallas as pl
from jax.experimental.pallas import tpu as pltpu


def _w_replication(in_w: int, out_w: int, dtype):
    """R^T[w, wo] = 1 iff floor(wo * in_w / out_w) == w  (PyTorch 'nearest')."""
    src = (jnp.arange(out_w) * in_w) // out_w
    return (jnp.arange(in_w)[:, None] == src[None, :]).astype(dtype)


def _pick_group(H: int, W: int, s: int, itemsize: int) -> int:
    """Smallest g (dividing H) with g*s^2*W a multiple of 128 lanes, under a
    per-dtype cap on the matmul reduction K = g*W."""
    lanes1 = s * s * W
    k_cap = 64 if itemsize >= 4 else 128       # f32 runs multi-pass on the MXU
    aligned = [g for g in range(1, H + 1)
               if H % g == 0 and (g * lanes1) % 128 == 0]
    ok = [g for g in aligned if g * W <= k_cap]
    if ok:
        return min(ok)
    if aligned:
        # W alone exceeds the K cap; lane alignment still wins.
        # TODO(synk): diagonal-block the selection matmul (K -> 128/s) for very
        # large W in f32 instead of paying K = W MACs per output element.
        return min(aligned)
    return 1                                   # tiny/odd planes: full-width block


def _pick_rows(r_total: int, lanes: int, itemsize: int,
               target_bytes: int = 6 << 20, min_steps: int = 4) -> int:
    """Super-rows per grid step: ~target_bytes output blocks, but keep at least
    `min_steps` grid steps so pipelining / megacore always have work."""
    rt_bytes = max(8, (target_bytes // (lanes * itemsize)) // 8 * 8)
    rt_steps = max(8, (pl.cdiv(r_total, min_steps)) // 8 * 8)
    return int(min(rt_bytes, rt_steps))


def _upsample_kernel(x_ref, m_ref, o_ref):
    # x: (rt, K), m: (K, lanes), o: (rt, lanes).  Each column of m has exactly
    # one 1, so accumulating directly in the (float) output dtype is exact.
    out_dt = o_ref.dtype
    acc_dt = out_dt if jnp.issubdtype(out_dt, jnp.floating) else jnp.float32
    o_ref[...] = jnp.dot(
        x_ref[...], m_ref[...], preferred_element_type=acc_dt
    ).astype(out_dt)


@functools.partial(jax.jit, static_argnames=("scale_factor",))
def upsample_nearest(x, scale_factor=2):
    """Nearest-neighbor upsample of an NCHW tensor (integer scale), matching
    F.interpolate(..., mode='nearest')."""
    s = int(scale_factor)
    assert s == scale_factor and s >= 1, "integer scale_factor only"
    # TODO(synk): per-axis / non-integer scale factors of F.interpolate('nearest')
    # are not covered by this index formula.
    N, C, H, W = x.shape
    Hout, Wout = H * s, W * s
    if s == 1:
        return x

    # Floats keep their own dtype (selection by a 0/1 matrix is exact);
    # integers route through f32.
    # TODO(synk): integer inputs with |x| >= 2^24 lose precision on the f32 path.
    dt = x.dtype if jnp.issubdtype(x.dtype, jnp.floating) else jnp.float32
    itemsize = jnp.dtype(dt).itemsize

    g = _pick_group(H, W, s, itemsize)        # rows fused per super-row (g | H)
    K = g * W                                 # matmul reduction length
    lanes = g * s * s * W                     # output block last dim
    r_total = (N * C * H) // g                # total super-rows
    rt = _pick_rows(r_total, lanes, itemsize)
    grid_n = int(pl.cdiv(r_total, rt))
    r_pad = grid_n * rt

    # Selection matrix M = kron(I_g, [Rw^T | Rw^T | ... s copies]).
    rwt = _w_replication(W, Wout, dt)                       # (W, Wout)
    m = jnp.kron(jnp.eye(g, dtype=dt), jnp.tile(rwt, (1, s)))   # (K, lanes)

    xf = x.reshape(r_total, K).astype(dt)                   # contiguous view
    if r_pad != r_total:
        xf = jnp.pad(xf, ((0, r_pad - r_total), (0, 0)))    # tail padding

    out2 = pl.pallas_call(
        _upsample_kernel,
        out_shape=jax.ShapeDtypeStruct((r_pad, lanes), x.dtype),
        grid_spec=pltpu.PrefetchScalarGridSpec(
            num_scalar_prefetch=0,
            grid=(grid_n,),
            in_specs=[
                pl.BlockSpec((rt, K), lambda i: (i, 0)),
                # Constant index_map -> refetch is skipped after step 0.
                pl.BlockSpec((K, lanes), lambda i: (0, 0)),
            ],
            out_specs=pl.BlockSpec((rt, lanes), lambda i: (i, 0)),
        ),
        compiler_params=pltpu.CompilerParams(
            dimension_semantics=("parallel",),
            vmem_limit_bytes=40 * 1024 * 1024,
        ),
    )(xf, m)

    out2 = out2[:r_total]
    # (r_total, g*s^2*W) is the exact row-major layout of (N, C, Hout, Wout).
    return out2.reshape(N, C, Hout, Wout)


if __name__ == "__main__":
    key = jax.random.PRNGKey(0)
    N, C, H, W = 2, 4, 16, 16
    scale = 2

    x = jax.random.normal(key, (N, C, H, W), dtype=jnp.float32)

    out = upsample_nearest(x, scale_factor=scale)
    out = jax.block_until_ready(out)

    # Pure-JAX reference (== F.interpolate(..., mode='nearest') for integer scale).
    ref = jnp.repeat(jnp.repeat(x, scale, axis=2), scale, axis=3)

    assert out.shape == (N, C, H * scale, W * scale), out.shape
    assert out.dtype == x.dtype
    assert jnp.allclose(out, ref, atol=1e-6), "mismatch vs reference"

    print("KERNEL_OK")
</pallas_src>

<mosaic_0001>
module attributes {stable_mosaic.version = 11 : i64} {
  func.func @_upsample_kernel(%arg0: i32, %arg1: memref<16x32xf32, #tpu.memory_space<vmem>>, %arg2: memref<32x128xf32, #tpu.memory_space<vmem>>, %arg3: memref<16x128xf32, #tpu.memory_space<vmem>>) attributes {dimension_semantics = [#tpu.dimension_semantics<parallel>], iteration_bounds = array<i64: 4>, scalar_prefetch = 0 : i64, scratch_operands = 0 : i64, tpu.core_type = #tpu.core_type<tc>, window_params = [{transform_indices = @transform_0, window_bounds = array<i64: 16, 32>}, {pipeline_mode = #tpu.pipeline_mode<synchronous>, transform_indices = @transform_1, window_bounds = array<i64: 32, 128>}, {transform_indices = @transform_2, window_bounds = array<i64: 16, 128>}]} {
    %c0 = arith.constant 0 : index
    %c0_0 = arith.constant 0 : index
    %0 = vector.load %arg1[%c0, %c0_0] : memref<16x32xf32, #tpu.memory_space<vmem>>, vector<16x32xf32>
    %c0_1 = arith.constant 0 : index
    %c0_2 = arith.constant 0 : index
    %1 = vector.load %arg2[%c0_1, %c0_2] : memref<32x128xf32, #tpu.memory_space<vmem>>, vector<32x128xf32>
    %cst = arith.constant dense<0.000000e+00> : vector<16x128xf32>
    %2 = tpu.matmul %0, %1, %cst {dimension_numbers = #tpu.dot_dimension_numbers<[1], [0], [0], [1], [0, 0, 1, 1], [], []>} : vector<16x32xf32>, vector<32x128xf32>, vector<16x128xf32> -> vector<16x128xf32>
    %c0_3 = arith.constant 0 : index
    %c0_4 = arith.constant 0 : index
    %3 = vector.load %arg3[%c0_3, %c0_4] : memref<16x128xf32, #tpu.memory_space<vmem>>, vector<16x128xf32>
    tpu.vector_store %arg3[%c0_3, %c0_4], %2 {strides = array<i32>} : memref<16x128xf32, #tpu.memory_space<vmem>>, vector<16x128xf32>,
    return
  }
  func.func @transform_0(%arg0: i32) -> (i32, i32) {
    %c0_i32 = arith.constant 0 : i32
    %c0_i32_0 = arith.constant 0 : i32
    return %arg0, %c0_i32 : i32, i32
  }
  func.func @transform_1(%arg0: i32) -> (i32, i32) {
    %c0_i32 = arith.constant 0 : i32
    %c0_i32_0 = arith.constant 0 : i32
    %c0_i32_1 = arith.constant 0 : i32
    return %c0_i32, %c0_i32_0 : i32, i32
  }
  func.func @transform_2(%arg0: i32) -> (i32, i32) {
    %c0_i32 = arith.constant 0 : i32
    %c0_i32_0 = arith.constant 0 : i32
    return %arg0, %c0_i32 : i32, i32
  }
}

</mosaic_0001>

<bundles_post_ra>
// kernel: upsample_nearest.1
= control target key start
LH: loop header
LB: loop body
LE: loop exit
PB: predicated region body
PF: predicated region fallthrough
CT: control target
= control target key end

     0   :  { %s362_s9 = smov 0   ;;  %s391_s0 = inlined_call_operand.vmem [shape: f32[64,32], index: 0, kind: input, shape index: {}]   ;;  %s392_s1 = inlined_call_operand.vmem [shape: f32[32,128], index: 1, kind: input, shape index: {}]   ;;  %s393_s2 = inlined_call_operand.vmem [shape: f32[64,128], index: 2, kind: output, shape index: {}]  }
   0x1 LB: > { %s293_s10 = sadd.s32 4294967295, %s345_s9   ;;  %p297_p0 = scmp.ge.s32.totalorder %s345_s9, 1  ;;  %s345_s9 = sphi %s362_s9, %s12_s9  }
   0x2   : > { %p113_p1 = scmp.lt.s32.totalorder %s345_s9, 5 }
   0x4   : > { %p114_p2 = pnand %p297_p0, %p113_p1 }
   0x5   : > { %v149_v0 = vld [vmem:[%s392_s1] sm:$0xff] (!%p114_p2)  ;;  %v150_v1 = vld [vmem:[%s392_s1 + $0x8] sm:$0xff] (!%p114_p2)  ;;  %v151_v2 = vld [vmem:[%s392_s1 + $0x10] sm:$0xff] (!%p114_p2)  ;;  %s298_s17 = sshll.u32 (!%p114_p2), %s293_s10, 1  ;;  %vm153_vm0 = vcmask (!%p114_p2), 261120  }
   0x6   : > { %117 = sbr.rel (%p114_p2) target bundleno = 232 (0xe8), region = 28  ;;  %v323_v3 = vpack.c.bf16 (!%p114_p2), %v150_v1, %v149_v0  ;;  %v152_v4 = vld [vmem:[%s392_s1 + $0x18] sm:$0xff] (!%p114_p2)  ;;  %p136_p3 = scmp.lt.s32.totalorder (!%p114_p2), %s298_s17, 7 }
   0x7   : > { %v327_v5 = vpack.c.bf16 (!%p114_p2), %v152_v4, %v151_v2 }
   0x8   : > { %324 = vmatprep.subr.bf16.mxu0 (!%p114_p2), %v323_v3 }
   0x9   : > { %326 = vmatpush3.bf16.msra.mxu0 (!%p114_p2), %v323_v3 }
   0xa   : > { %328 = vmatprep.subr.bf16.mxu0 (!%p114_p2), %v327_v5 }
   0xd   : > { %s395_s17 = smov (!%p136_p3, %s298_s17), 7  ;;  %330 = vmatpush3.bf16.msra.mxu0 %v327_v5 }
   0xe   : > { %s299_s20 = sshll.u32 %s395_s17, 3 }
   0xf   : > { %s139_s23 = scalar_lea.vmem %s391_s0, %s299_s20  ;;  %s145_s26 = scalar_lea.vmem %s393_s2, %s299_s20 }
  0x10   : > { %v147_v6 = vld [vmem:[%s139_s23] sm:$0xff]  ;;  %v148_v7 = vld [vmem:[%s139_s23 + $0x8] sm:$0xff] }
  0x11   : > { %320 = vmatprep.mubr.msk.f32.mxu0 %vm153_vm0, %v147_v6 }
  0x12   : > { %321 = vmatmul.mubr.msk.f32.vlgmr.msra.gmra.mrb[0].mxu0 %vm153_vm0, %v148_v7 }
  0xe5   : > { %v322_v8 = vpop.f32.mrb[0].mxu0 }
  0xe6   : > { %v226_v9 = vpop.f32.mrb[1].mxu0  ;;  %236 = vst [vmem:[%s145_s26 + $0x8] sm:$0xff] %v322_v8 }
  0xe7   : > { %235 = vst [vmem:[%s145_s26] sm:$0xff] %v226_v9 }
  0xe8 PF: > { %s12_s9 = sadd.s32 1, %s345_s9  }
  0xe9   : > { %p9_p4 = scmp.ge.s32.totalorder %s12_s9, 6  }
  0xeb   :  { %11 = sbr.rel (!%p9_p4) target bundleno = 1 (0x1), region = 58 }

</bundles_post_ra>
